<compile_context>
chip_gen: v7x
topology: tpu7x:2x2x1
jax: 0.10.0
libtpu: 0.0.40
codegen_flags: <defaults>
</compile_context>

<pallas_src>
import functools

import jax
import jax.numpy as jnp
from jax.experimental import pallas as pl
from jax.experimental.pallas import tpu as pltpu


# ----------------------------------------------------------------------------
# Kernel 1: tiled matmul + bias (+ optional ReLU)
#   bf16 operands, f32 accumulator, selectable output dtype.
# ----------------------------------------------------------------------------
def _matmul_bias_act_kernel(x_ref, w_ref, b_ref, o_ref, acc_ref, *, relu):
    @pl.when(pl.program_id(2) == 0)
    def _():
        acc_ref[...] = jnp.zeros_like(acc_ref)

    acc_ref[...] += jnp.dot(x_ref[...], w_ref[...],
                            preferred_element_type=jnp.float32)

    @pl.when(pl.program_id(2) == pl.num_programs(2) - 1)
    def _():
        r = acc_ref[...] + b_ref[...]
        if relu:
            r = jnp.maximum(r, 0.0)
        o_ref[...] = r.astype(o_ref.dtype)


def matmul_bias_act(x, w, b, *, tm, tn, tk, relu=False, out_dtype=jnp.float32):
    M, K = x.shape
    K2, N = w.shape
    assert K == K2 and M % tm == 0 and N % tn == 0 and K % tk == 0
    grid = (M // tm, N // tn, K // tk)
    return pl.pallas_call(
        functools.partial(_matmul_bias_act_kernel, relu=relu),
        out_shape=jax.ShapeDtypeStruct((M, N), out_dtype),
        grid_spec=pltpu.PrefetchScalarGridSpec(
            num_scalar_prefetch=0, grid=grid,
            in_specs=[pl.BlockSpec((tm, tk), lambda i, j, k: (i, k)),
                      pl.BlockSpec((tk, tn), lambda i, j, k: (k, j)),
                      pl.BlockSpec((1, tn), lambda i, j, k: (0, j))],
            out_specs=pl.BlockSpec((tm, tn), lambda i, j, k: (i, j)),
            scratch_shapes=[pltpu.VMEM((tm, tn), jnp.float32)]),
        compiler_params=pltpu.CompilerParams(
            dimension_semantics=("parallel", "parallel", "arbitrary")),
    )(x, w, b.reshape(1, -1))


# ----------------------------------------------------------------------------
# Kernel 2: RoIAlignAvg — one plain MXU matmul per batch element
#   roi_w_b    : (B, n_per*P*P, Hf*Wf)   bilinear pooling weights (batch-grouped)
#   feat_hw_tc : (B, Hf*Wf, T*C)         channel-last feature (no in-kernel xpose)
#   output     : (B, n_per*P*P, T*C)
# ROIs MUST be grouped by batch (they are, from make_rois): one feature block
# DMA per grid step, grid axis marked "parallel" for megacore.
# ----------------------------------------------------------------------------
def _roi_pool_kernel(w_ref, feat_ref, o_ref):
    o_ref[0] = jnp.dot(w_ref[0], feat_ref[0],
                       preferred_element_type=jnp.float32).astype(o_ref.dtype)


def roi_align_avg_pallas(feat_hw_tc, roi_w_b):
    B, HW, TC = feat_hw_tc.shape
    B2, MP, HW2 = roi_w_b.shape
    assert B == B2 and HW == HW2
    return pl.pallas_call(
        _roi_pool_kernel,
        out_shape=jax.ShapeDtypeStruct((B, MP, TC), jnp.bfloat16),
        grid_spec=pltpu.PrefetchScalarGridSpec(
            num_scalar_prefetch=0, grid=(B,),
            in_specs=[pl.BlockSpec((1, MP, HW), lambda b: (b, 0, 0)),
                      pl.BlockSpec((1, HW, TC), lambda b: (b, 0, 0))],
            out_specs=pl.BlockSpec((1, MP, TC), lambda b: (b, 0, 0))),
        compiler_params=pltpu.CompilerParams(
            dimension_semantics=("parallel",)),
    )(roi_w_b, feat_hw_tc)


# ----------------------------------------------------------------------------
# Kernel 3: fused _head_to_tail mean (over D*H) + act_bbox_pred linear
#   y : (R, D*H, W*C)  bf16   (pure reshape of the top-conv output, (w,c) lanes)
#   w : (W*C, out_f)   bf16   (rows permuted to (w,c) ordering in the wrapper)
#   o : (R, out_f)     f32
# ----------------------------------------------------------------------------
def _mean_linear_kernel(y_ref, w_ref, b_ref, o_ref):
    fc7 = jnp.mean(y_ref[...].astype(jnp.float32), axis=1)
    o_ref[...] = (jnp.dot(fc7.astype(jnp.bfloat16), w_ref[...],
                          preferred_element_type=jnp.float32)
                  + b_ref[...]).astype(o_ref.dtype)


def mean_linear_pallas(y, w, b):
    R, Mid, CW = y.shape
    CW2, Nout = w.shape
    assert CW == CW2
    return pl.pallas_call(
        _mean_linear_kernel,
        out_shape=jax.ShapeDtypeStruct((R, Nout), jnp.float32),
        grid_spec=pltpu.PrefetchScalarGridSpec(
            num_scalar_prefetch=0, grid=(1,),
            in_specs=[pl.BlockSpec((R, Mid, CW), lambda i: (0, 0, 0)),
                      pl.BlockSpec((CW, Nout), lambda i: (0, 0)),
                      pl.BlockSpec((1, Nout), lambda i: (0, 0))],
            out_specs=pl.BlockSpec((R, Nout), lambda i: (0, 0))),
        compiler_params=pltpu.CompilerParams(
            dimension_semantics=("arbitrary",)),
    )(y, w, b.reshape(1, -1))


# ----------------------------------------------------------------------------
# Glue: im2col for 3D conv (NCDHW), ROI weights, synthetic ROIs, params
# ----------------------------------------------------------------------------
def im2col_3d(x, ksize, stride, pad):
    """x: (N, C, D, H, W) -> (N*Do*Ho*Wo, C*ksize^3), column order (C, dz, dy, dx)."""
    N, C, D, H, W = x.shape
    sd, sh, sw = stride
    xp = jnp.pad(x, ((0, 0), (0, 0), (pad, pad), (pad, pad), (pad, pad)))
    Do = (D + 2 * pad - ksize) // sd + 1
    Ho = (H + 2 * pad - ksize) // sh + 1
    Wo = (W + 2 * pad - ksize) // sw + 1
    cols = []
    for dz in range(ksize):
        for dy in range(ksize):
            for dx in range(ksize):
                cols.append(xp[:, :,
                               dz:dz + Do * sd:sd,
                               dy:dy + Ho * sh:sh,
                               dx:dx + Wo * sw:sw])
    p = jnp.stack(cols, axis=2)                      # (N, C, k^3, Do, Ho, Wo)
    p = p.transpose(0, 3, 4, 5, 1, 2)                # (N, Do, Ho, Wo, C, k^3)
    return p.reshape(N * Do * Ho * Wo, C * ksize ** 3), (Do, Ho, Wo)


def roi_align_weights(rois, feat_h, feat_w, pool, spatial_scale):
    """RoIAlign (sampling_ratio=1) weights: (R, pool*pool, feat_h*feat_w)."""
    x1 = rois[:, 1] * spatial_scale
    y1 = rois[:, 2] * spatial_scale
    x2 = rois[:, 3] * spatial_scale
    y2 = rois[:, 4] * spatial_scale
    bin_h = (y2 - y1) / pool
    bin_w = (x2 - x1) / pool
    centers = jnp.arange(pool, dtype=jnp.float32) + 0.5
    cy = y1[:, None] + centers[None, :] * bin_h[:, None]   # (R, P)
    cx = x1[:, None] + centers[None, :] * bin_w[:, None]   # (R, P)

    def split(c, size):
        c = jnp.clip(c, 0.0, size - 1.0)
        lo = jnp.floor(c)
        frac = c - lo
        lo = lo.astype(jnp.int32)
        hi = jnp.minimum(lo + 1, size - 1)
        return lo, hi, frac

    y0, y1i, fy = split(cy, feat_h)
    x0, x1i, fx = split(cx, feat_w)

    def corner(yi, xi, wy, wx):
        idx = yi[:, :, None] * feat_w + xi[:, None, :]      # (R, P, P)
        w = wy[:, :, None] * wx[:, None, :]                  # (R, P, P)
        return w[..., None] * jax.nn.one_hot(idx, feat_h * feat_w,
                                             dtype=jnp.float32)

    w = (corner(y0, x0, 1.0 - fy, 1.0 - fx) + corner(y0, x1i, 1.0 - fy, fx)
         + corner(y1i, x0, fy, 1.0 - fx) + corner(y1i, x1i, fy, fx))
    R = rois.shape[0]
    return w.reshape(R, pool * pool, feat_h * feat_w)


def make_rois(batch, n_per, T):
    # TODO(synk): replaces _RPN proposals — deterministic tube boxes, grouped by
    # batch index (required by the per-batch ROI pooling kernel).
    k = jnp.arange(batch * n_per, dtype=jnp.float32)
    bidx = jnp.repeat(jnp.arange(batch, dtype=jnp.float32), n_per)
    x1 = (k % 4) * 4.0 + 1.0
    y1 = ((k // 4) % 4) * 4.0 + 1.0
    x2 = x1 + 14.0
    y2 = y1 + 14.0
    t1 = jnp.zeros_like(k)
    t2 = jnp.full_like(k, float(T - 1))
    return jnp.stack([bidx, x1, y1, x2, y2, t1, t2], axis=1).reshape(batch, n_per, 7)


STEM_K_PAD = 128   # 81 -> 128 lane-aligned K


def init_params(key, n_classes, time_dim):
    """normal_init(0, std) as in _init_weights; BN folded to identity; bf16 weights."""
    k1, k2, k3 = jax.random.split(key, 3)
    w_base = jax.random.normal(k1, (256, 3, 3, 3, 3), jnp.float32) * 0.01
    w_top = jax.random.normal(k2, (512, 256, 3, 3, 3), jnp.float32) * 0.01
    out_f = time_dim * 4 * n_classes
    w_bbox = jax.random.normal(k3, (out_f, 2048), jnp.float32) * 0.001

    w_base_m = w_base.reshape(256, -1).T                                 # (81, 256)
    w_base_m = jnp.pad(w_base_m, ((0, STEM_K_PAD - w_base_m.shape[0]), (0, 0)))
    return {
        "w_base": w_base_m.astype(jnp.bfloat16),                         # (128, 256)
        "b_base": jnp.zeros((256,), jnp.float32),
        "w_top": (w_top.reshape(512, -1).T).astype(jnp.bfloat16),        # (6912, 512)
        "b_top": jnp.zeros((512,), jnp.float32),
        "w_bbox": w_bbox.T.astype(jnp.bfloat16),                         # (2048, out_f)
        "b_bbox": jnp.zeros((out_f,), jnp.float32),
    }


# ----------------------------------------------------------------------------
# ACT_net forward (inference branch)
# ----------------------------------------------------------------------------
POOL = 7
N_PER_BATCH = 8


def act_net_forward(params, im_data, im_info, gt_tubes, gt_rois, num_boxes):
    del im_info, gt_tubes, gt_rois, num_boxes  # inference path does not use them
    B, Cin, T, H, W = im_data.shape

    # --- act_base: conv3d(3->256, k3, stride(1,2,2), pad1) + BN(id) + ReLU ----
    cols, (Do, Ho, Wo) = im2col_3d(im_data, 3, (1, 2, 2), 1)          # (4096, 81)
    cols = jnp.pad(cols, ((0, 0), (0, STEM_K_PAD - cols.shape[1])))   # K -> 128
    cols = cols.astype(jnp.bfloat16)
    feat = matmul_bias_act(cols, params["w_base"], params["b_base"],
                           tm=256, tn=256, tk=STEM_K_PAD, relu=True,
                           out_dtype=jnp.bfloat16)                    # (4096, 256)
    # matmul rows are already channel-last (N, D, H, W, C) — no NCDHW transpose
    base_feat_cl = feat.reshape(B, Do, Ho, Wo, 256)

    # --- act_rpn / proposal target: synthetic ROIs (inference branch) ---------
    rois = make_rois(B, N_PER_BATCH, Do)                              # (B, 8, 7)
    rois_flat = rois.reshape(-1, 7)                                   # (16, 7), batch-grouped
    R = rois_flat.shape[0]

    # --- act_roi_align (RoIAlignAvg): per-batch plain matmul ------------------
    spatial_scale = float(Ho) / float(H)                              # 1/2 here
    roi_w = roi_align_weights(rois_flat, Ho, Wo, POOL, spatial_scale)
    roi_w_b = roi_w.reshape(B, N_PER_BATCH * POOL * POOL,
                            Ho * Wo).astype(jnp.bfloat16)             # (B, 392, HW)
    # single wrapper transpose: (B, Hf*Wf, T*C) channel-last feature slab
    feat_hw_tc = base_feat_cl.transpose(0, 2, 3, 1, 4).reshape(B, Ho * Wo, Do * 256)
    pooled = roi_align_avg_pallas(feat_hw_tc, roi_w_b)                # (B, 392, T*C) bf16
    pooled = pooled.reshape(R, POOL * POOL, Do * 256)
    pooled_feat = pooled.reshape(R, POOL, POOL, Do, 256).transpose(0, 4, 3, 1, 2)
    # pooled_feat: (R, 256, T, 7, 7) NCDHW per ROI, bf16
    # TODO(synk): RoIAlignAvg temporal cropping is not reproducible without its
    # source; ROIs span the full time extent of the feature map here.

    # --- _head_to_tail: act_top (layer4 simplified to conv3d 256->512, s2) ----
    cols_t, (Dt, Ht, Wt) = im2col_3d(pooled_feat, 3, (2, 2, 2), 1)    # (1024, 6912) bf16
    # tm=512 -> grid M=2 ("parallel"): both v7x TCs busy, w_top streamed only 2x.
    # (On single-TC v6e, tm=1024 would make it a single weight sweep.)
    top = matmul_bias_act(cols_t, params["w_top"], params["b_top"],
                          tm=512, tn=512, tk=1152, relu=True,
                          out_dtype=jnp.bfloat16)                     # (1024, 512) bf16

    # fc7 = act_top(pool5).mean(3).mean(2).view(R, -1), fused with act_bbox_pred.
    # top rows are (r, d, h, w)-ordered -> pure reshape, last axis laid out (w, c).
    y = top.reshape(R, Dt * Ht, Wt * 512)                             # (16, 16, 2048)
    # permute linear rows (c, w) -> (w, c) once on the tiny weight instead of
    # transposing the activation.
    out_f = params["w_bbox"].shape[1]
    w_bbox_perm = params["w_bbox"].reshape(512, Wt, out_f).transpose(1, 0, 2)
    w_bbox_perm = w_bbox_perm.reshape(Wt * 512, out_f)
    bbox_pred = mean_linear_pallas(y, w_bbox_perm, params["b_bbox"])  # (R, out_f)
    bbox_pred = bbox_pred.reshape(B, rois.shape[1], -1)

    z = jnp.zeros((1,), jnp.float32)
    return rois, bbox_pred, z, z, z, z


# ----------------------------------------------------------------------------
if __name__ == "__main__":
    actions = ("a", "b", "c", "d")     # n_classes = 4
    time_dim = 8                       # small-shape stand-in for 16

    key = jax.random.PRNGKey(0)
    k_data, _ = jax.random.split(key)
    im_data = jax.random.normal(k_data, (2, 3, 8, 32, 32), jnp.float32)
    im_info = jnp.array([[32.0, 32.0, 1.0], [32.0, 32.0, 1.0]], jnp.float32)
    gt_tubes = jnp.zeros((2, 1, 7), jnp.float32)
    gt_rois = jnp.zeros((2, 1, 5), jnp.float32)
    num_boxes = jnp.zeros((2,), jnp.int32)

    params = init_params(jax.random.PRNGKey(42), len(actions), time_dim)

    outs = act_net_forward(params, im_data, im_info, gt_tubes, gt_rois, num_boxes)
    outs = jax.block_until_ready(outs)

    rois, bbox_pred = outs[0], outs[1]
    assert rois.shape == (2, 8, 7), rois.shape
    assert bbox_pred.shape == (2, 8, time_dim * 4 * len(actions)), bbox_pred.shape
    assert bool(jnp.all(jnp.isfinite(bbox_pred)))
    print("KERNEL_OK")
</pallas_src>

<mosaic_0001>
module attributes {stable_mosaic.version = 11 : i64} {
  func.func @_matmul_bias_act_kernel(%arg0: i32, %arg1: i32, %arg2: i32, %arg3: memref<256x128xbf16, #tpu.memory_space<vmem>>, %arg4: memref<128x256xbf16, #tpu.memory_space<vmem>>, %arg5: memref<1x256xf32, #tpu.memory_space<vmem>>, %arg6: memref<256x256xbf16, #tpu.memory_space<vmem>>, %arg7: memref<256x256xf32, #tpu.memory_space<vmem>>) attributes {dimension_semantics = [#tpu.dimension_semantics<parallel>, #tpu.dimension_semantics<parallel>, #tpu.dimension_semantics<arbitrary>], iteration_bounds = array<i64: 16, 1, 1>, scalar_prefetch = 0 : i64, scratch_operands = 1 : i64, tpu.core_type = #tpu.core_type<tc>, window_params = [{transform_indices = @transform_0, window_bounds = array<i64: 256, 128>}, {transform_indices = @transform_1, window_bounds = array<i64: 128, 256>}, {transform_indices = @transform_2, window_bounds = array<i64: 1, 256>}, {transform_indices = @transform_3, window_bounds = array<i64: 256, 256>}]} {
    %c0_i32 = arith.constant 0 : i32
    %0 = arith.cmpi eq, %arg2, %c0_i32 : i32
    %1 = arith.extui %0 : i1 to i32
    %c0_i32_0 = arith.constant 0 : i32
    %2 = arith.cmpi ne, %1, %c0_i32_0 : i32
    scf.if %2 {
      %cst_10 = arith.constant 0.000000e+00 : f32
      %12 = vector.broadcast %cst_10 : f32 to vector<256x256xf32>
      %c0_11 = arith.constant 0 : index
      %c0_12 = arith.constant 0 : index
      %13 = vector.load %arg7[%c0_11, %c0_12] : memref<256x256xf32, #tpu.memory_space<vmem>>, vector<256x256xf32>
      tpu.vector_store %arg7[%c0_11, %c0_12], %12 {strides = array<i32>} : memref<256x256xf32, #tpu.memory_space<vmem>>, vector<256x256xf32>,
    } else {
    }
    %c0 = arith.constant 0 : index
    %c0_1 = arith.constant 0 : index
    %3 = vector.load %arg7[%c0, %c0_1] : memref<256x256xf32, #tpu.memory_space<vmem>>, vector<256x256xf32>
    %c0_2 = arith.constant 0 : index
    %c0_3 = arith.constant 0 : index
    %4 = vector.load %arg3[%c0_2, %c0_3] : memref<256x128xbf16, #tpu.memory_space<vmem>>, vector<256x128xbf16>
    %c0_4 = arith.constant 0 : index
    %c0_5 = arith.constant 0 : index
    %5 = vector.load %arg4[%c0_4, %c0_5] : memref<128x256xbf16, #tpu.memory_space<vmem>>, vector<128x256xbf16>
    %cst = arith.constant dense<0.000000e+00> : vector<256x256xf32>
    %6 = tpu.matmul %4, %5, %cst {dimension_numbers = #tpu.dot_dimension_numbers<[1], [0], [0], [1], [0, 0, 1, 1], [], []>} : vector<256x128xbf16>, vector<128x256xbf16>, vector<256x256xf32> -> vector<256x256xf32>
    %7 = arith.addf %3, %6 : vector<256x256xf32>
    %c0_6 = arith.constant 0 : index
    %c0_7 = arith.constant 0 : index
    %8 = vector.load %arg7[%c0_6, %c0_7] : memref<256x256xf32, #tpu.memory_space<vmem>>, vector<256x256xf32>
    tpu.vector_store %arg7[%c0_6, %c0_7], %7 {strides = array<i32>} : memref<256x256xf32, #tpu.memory_space<vmem>>, vector<256x256xf32>,
    %c0_i32_8 = arith.constant 0 : i32
    %9 = arith.cmpi eq, %arg2, %c0_i32_8 : i32
    %10 = arith.extui %9 : i1 to i32
    %c0_i32_9 = arith.constant 0 : i32
    %11 = arith.cmpi ne, %10, %c0_i32_9 : i32
    scf.if %11 {
      %c0_10 = arith.constant 0 : index
      %c0_11 = arith.constant 0 : index
      %12 = vector.load %arg7[%c0_10, %c0_11] : memref<256x256xf32, #tpu.memory_space<vmem>>, vector<256x256xf32>
      %c0_12 = arith.constant 0 : index
      %c0_13 = arith.constant 0 : index
      %13 = vector.load %arg5[%c0_12, %c0_13] : memref<1x256xf32, #tpu.memory_space<vmem>>, vector<1x256xf32>
      %14 = vector.broadcast %13 : vector<1x256xf32> to vector<256x256xf32>
      %15 = arith.addf %12, %14 : vector<256x256xf32>
      %cst_14 = arith.constant 0.000000e+00 : f32
      %16 = vector.broadcast %cst_14 : f32 to vector<256x256xf32>
      %17 = arith.maximumf %15, %16 : vector<256x256xf32>
      %18 = arith.truncf %17 : vector<256x256xf32> to vector<256x256xbf16>
      %c0_15 = arith.constant 0 : index
      %c0_16 = arith.constant 0 : index
      %19 = vector.load %arg6[%c0_15, %c0_16] : memref<256x256xbf16, #tpu.memory_space<vmem>>, vector<256x256xbf16>
      tpu.vector_store %arg6[%c0_15, %c0_16], %18 {strides = array<i32>} : memref<256x256xbf16, #tpu.memory_space<vmem>>, vector<256x256xbf16>,
    } else {
    }
    return
  }
  func.func @transform_0(%arg0: i32, %arg1: i32, %arg2: i32) -> (i32, i32) {
    %c0_i32 = arith.constant 0 : i32
    return %arg0, %arg2 : i32, i32
  }
  func.func @transform_1(%arg0: i32, %arg1: i32, %arg2: i32) -> (i32, i32) {
    %c0_i32 = arith.constant 0 : i32
    return %arg2, %arg1 : i32, i32
  }
  func.func @transform_2(%arg0: i32, %arg1: i32, %arg2: i32) -> (i32, i32) {
    %c0_i32 = arith.constant 0 : i32
    %c0_i32_0 = arith.constant 0 : i32
    return %c0_i32, %arg1 : i32, i32
  }
  func.func @transform_3(%arg0: i32, %arg1: i32, %arg2: i32) -> (i32, i32) {
    %c0_i32 = arith.constant 0 : i32
    return %arg0, %arg1 : i32, i32
  }
}

</mosaic_0001>

<bundles_post_ra>
// kernel: tpu_custom_call.1
= control target key start
LH: loop header
LB: loop body
LE: loop exit
PB: predicated region body
PF: predicated region fallthrough
CT: control target
= control target key end

     0   :  { %8 = vsyncpa [#allocation4], 0  ;;  %s2362_s0 = inlined_call_operand.hbm [shape: bf16[4096,128], index: 0, kind: input, shape index: {}]   ;;  %s2363_s1 = inlined_call_operand.hbm [shape: bf16[128,256], index: 1, kind: input, shape index: {}]   ;;  %s2364_s2 = inlined_call_operand.hbm [shape: f32[1,256], index: 2, kind: input, shape index: {}]   ;;  %s2365_s3 = inlined_call_operand.hbm [shape: bf16[4096,256], index: 3, kind: output, shape index: {}]  }
   0x1   :  { %10 = vsyncpa [#allocation4 + $0x1], 0 }
   0x2   :  { %11 = vsyncpa [#allocation7], 0 }
   0x3   :  { %12 = vsyncpa [#allocation5], 0 }
   0x4   :  { %14 = vsyncpa [#allocation5 + $0x1], 0  ;;  %s1978_s12 = smov 0   ;;  %s1980_s13 = smov 0  }
   0x5   :  { %s1982_s14 = smov 0   ;;  %s1984_s15 = smov 0  }
   0x6   :  { %s1986_s16 = smov 0   ;;  %s1988_s17 = smov 0  }
   0x7 LB: > { %s1508_s18 = sadd.s32 4294967295, %s1945_s17   ;;  %s1509_s19 = sadd.s32 4294967294, %s1945_s17   ;;  %s1945_s17 = sphi %s1988_s17, %s20_s17   ;;  %s1941_s16 = sphi %s1986_s16, %s2387_s16   ;;  %s1937_s15 = sphi %s1984_s15, %s2386_s15   ;;  %s1933_s14 = sphi %s1982_s14, %s2385_s14   ;;  %s1929_s13 = sphi %s1980_s13, %s2384_s13   ;;  %s1925_s12 = sphi %s1978_s12, %s2383_s12  }
   0x8   : > { %p61_p0 = scmp.ne.s32.totalorder %s1929_s13, %s1925_s12  ;;  %p2012_p1 = scmp.eq.s32.totalorder %s1508_s18, 0 }
   0x9   : > { %p2016_p2 = scmp.eq.s32.totalorder %s1508_s18, 15  ;;  %p147_p3 = scmp.eq.s32.totalorder %s1509_s19, 15 }
   0xa   : > { %s2370_s20 = scalar_select %p2012_p1, 1, 0 }
   0xb   : > { %s2371_s21 = scalar_select %p2016_p2, 1, 0 }
   0xc   : > { %p2022_p4 = por %p2012_p1, %p61_p0  ;;  %p1510_p5 = scmp.ge.s32.totalorder %s1945_s17, 1 }
   0xd   : > { %p2027_p6 = por %p147_p3, %p61_p0  ;;  %p154_p7 = scmp.lt.s32.totalorder %s1945_s17, 17 }
   0xe   : > { %s2372_s22 = scalar_select %p2022_p4, 1, 0 }
   0xf   : > { %s2373_s23 = scalar_select %p2027_p6, 1, 0 }
  0x10   : > { %p2032_p8 = pnand %p1510_p5, %p154_p7  ;;  %s1947_s25 = smov [#allocation6]  }
  0x11   : > { %s172_s26 = sshll.u32 %s1947_s25, 4  ;;  %s1948_s28 = smov [#allocation8]   ;;  %s173_s26 = int_to_ptr.vmem [resolvable:$true] %s172_s26 }
  0x12   : > { %s2374_s24 = scalar_select %p2032_p8, 1, 0 }
  0x13   : > { %p1655_p9 = pneg %p2032_p8  ;;  %s189_s29 = sshll.u32 %s1948_s28, 4  ;;  %s2044_s29 = int_to_ptr.vmem [resolvable:$true] %s189_s29 }
  0x14   : > { %s1773_s5 = scalar_lea.hbm %s2363_s1, 2048 }
  0x15   : > { %p2040_p10 = pnand %p1655_p9, %p2012_p1  ;;  %p1774_p11 = scmp.ne.s32.totalorder %s2363_s1, %s1773_s5 }
  0x16   : > { %p1780_p3 = scmp.lt.u32.totalorder %s1773_s5, %s2363_s1 }
  0x17   : > { %p1775_p12 = pneg %p2040_p10 }
  0x19   : > { %p1776_p13 = pnand %p1775_p12, %p1774_p11 }
  0x1b   : > { %p1777_p0 = pneg %p1776_p13 }
  0x1d   : > { %p1782_p5 = pnand %p1780_p3, %p1777_p0 }
  0x1f   : > { %1785 = shalt.err (!%p1782_p5)
}
  0x20   : > { %s1786_s10 = scalar_lea.vmem %s173_s26, 2048  ;;  %p1794_p1 = scmp.lt.s32.totalorder %s173_s26, %s173_s26 }
  0x21   : > { %p1787_p7 = scmp.ne.s32.totalorder %s173_s26, %s1786_s10  ;;  %p1795_p4 = scmp.lt.s32.totalorder %s1786_s10, %s1786_s10 }
  0x23   : > { %p1789_p9 = pnand %p1787_p7, %p1775_p12  ;;  %p1796_p8 = por %p1795_p4, %p1794_p1 }
  0x25   : > { %p1790_p6 = pneg %p1789_p9 }
  0x27   : > { %p1797_p2 = pnand %p1796_p8, %p1790_p6 }
  0x29   : > { %1800 = shalt.err (!%p1797_p2)
}
  0x2a   : > { %s1949_s11 = smov 128   ;;  %s1950_s18 = smov 8  }
  0x2b   : > { %1658 = dma.hbm_to_vmem [thread:$0]  (!%p2040_p10), %s2363_s1, 2048, %s173_s26, [#allocation7], %s1949_s11, %s1949_s11, %s1950_s18  }
  0x2c   : > { %s1801_s4 = scalar_lea.hbm %s2364_s2, 32 }
  0x2d   : > { %p1802_p11 = scmp.ne.s32.totalorder %s2364_s2, %s1801_s4  ;;  %p1808_p4 = scmp.lt.u32.totalorder %s1801_s4, %s2364_s2 }
  0x2f   : > { %p1804_p1 = pnand %p1802_p11, %p1775_p12 }
  0x31   : > { %p1805_p2 = pneg %p1804_p1 }
  0x33   : > { %p1810_p6 = pnand %p1808_p4, %p1805_p2 }
  0x35   : > { %1813 = shalt.err (!%p1810_p6)
}
  0x36   : > { %s1814_s26 = scalar_lea.vmem %s2044_s29, 32  ;;  %p1822_p3 = scmp.lt.s32.totalorder %s2044_s29, %s2044_s29 }
  0x37   : > { %p1815_p8 = scmp.ne.s32.totalorder %s2044_s29, %s1814_s26  ;;  %p1823_p5 = scmp.lt.s32.totalorder %s1814_s26, %s1814_s26 }
  0x39   : > { %p1817_p13 = pnand %p1815_p8, %p1775_p12  ;;  %p1824_p7 = por %p1823_p5, %p1822_p3 }
  0x3b   : > { %p1818_p0 = pneg %p1817_p13 }
  0x3d   : > { %p1825_p9 = pnand %p1824_p7, %p1818_p0 }
  0x3f   : > { %1828 = shalt.err (!%p1825_p9)
}
  0x40   : > { %1661 = dma.hbm_to_vmem [thread:$0]  (!%p2040_p10), %s2364_s2, 32, %s2044_s29, [#allocation7]  }
  0x41   : > { %s39_s11 = sadd.s32 1, %s1941_s16  ;;  %s48_s18 = sadd.s32 1, %s1933_s14 }
  0x42   : > { %p41_p12 = scmp.ge.s32.totalorder %s39_s11, 16  ;;  %p55_p11 = scmp.ne.s32.totalorder %s1933_s14, %s1929_s13 }
  0x43   : > { %p56_p1 = scmp.eq.s32.totalorder %s1945_s17, 0  ;;  %p1672_p2 = scmp.lt.s32.totalorder %s1945_s17, 16 }
  0x44   : > { %s2389_s11 = smov (%p41_p12, %s39_s11), 0  ;;  %p2376_p6 = scmp.ne.s32.totalorder %s2371_s21, 0 }
  0x45   : > { %p57_p4 = por %p56_p1, %p55_p11  ;;  %s43_s19 = ssub.s32 %s1941_s16, %s2389_s11 }
  0x46   : > { %p2103_p8 = por %p2376_p6, %p55_p11  ;;  %s200_s25 = sand.u32 1, %s1933_s14  }
  0x47   : > { %p46_p13 = scmp.eq.s32.totalorder %s43_s19, 0  ;;  %s1514_s29 = sshll.u32 %s200_s25, 7 }
  0x48   : > { %s1592_s28 = sshll.u32 %s1941_s16, 11  ;;  %s204_s21 = scalar_lea.vmem [#allocation3], %s1514_s29 }
  0x49   : > { %s2112_s30 = scalar_select %p46_p13, %s1933_s14, %s48_s18  }
  0x4a   : > { %s2117_s6 = scalar_lea.hbm %s2362_s0, %s1592_s28  ;;  %s212_s7 = sshll.u32 %s204_s21, 4  ;;  %s2125_s7 = int_to_ptr.vmem [resolvable:$true] %s212_s7 }
  0x4b   : > { %p2121_p10 = pnand %p1672_p2, %p57_p4  ;;  %s2127_s26 = scalar_lea.sflag [#allocation4], %s200_s25 }
  0x4c   : > { %s1829_s9 = scalar_lea.hbm %s2117_s6, 2048  ;;  %s1834_s19 = scalar_lea.hbm %s2362_s0, 32768 }
  0x4d   : > { %p1830_p0 = scmp.ne.s32.totalorder %s2117_s6, %s1829_s9  ;;  %p1831_p3 = pneg %p2121_p10 }
  0x4e   : > { %p1835_p9 = scmp.lt.u32.totalorder %s2117_s6, %s2362_s0  ;;  %p1836_p12 = scmp.lt.u32.totalorder %s1834_s19, %s1829_s9 }
  0x4f   : > { %p1832_p5 = pnand %p1831_p3, %p1830_p0  ;;  %p1838_p1 = scmp.lt.u32.totalorder %s1829_s9, %s2117_s6 }
  0x50   : > { %p1837_p11 = por %p1836_p12, %p1835_p9 }
  0x51   : > { %p1833_p7 = pneg %p1832_p5 }
  0x52   : > { %p1839_p2 = por %p1838_p1, %p1837_p11 }
  0x54   : > { %p1840_p4 = pnand %p1839_p2, %p1833_p7 }
  0x56   : > { %1843 = shalt.err (!%p1840_p4)
}
  0x57   : > { %s1844_s25 = scalar_lea.vmem %s2125_s7, 2048  ;;  %s1951_s4 = smov [#allocation3]  }
  0x58   : > { %p1845_p6 = scmp.ne.s32.totalorder %s2125_s7, %s1844_s25  ;;  %s1849_s5 = sshll.u32 %s1951_s4, 4  ;;  %s1850_s5 = int_to_ptr.vmem [resolvable:$false] %s1849_s5 }
  0x59   : > { %s1851_s21 = scalar_lea.vmem %s1850_s5, 4096  ;;  %p1852_p5 = scmp.lt.s32.totalorder %s2125_s7, %s1850_s5 }
  0x5a   : > { %p1847_p13 = pnand %p1845_p6, %p1831_p3  ;;  %p1853_p9 = scmp.lt.s32.totalorder %s1851_s21, %s1844_s25 }
  0x5c   : > { %p1848_p0 = pneg %p1847_p13  ;;  %p1854_p12 = por %p1853_p9, %p1852_p5 }
  0x5e   : > { %p1855_p11 = pnand %p1854_p12, %p1848_p0 }
  0x60   : > { %1858 = shalt.err (!%p1855_p11)
}
  0x61   : > { %s1952_s9 = smov 64   ;;  %s1953_s10 = smov 4  }
  0x62   : > { %1665 = dma.hbm_to_vmem [thread:$0]  (!%p2121_p10), %s2117_s6, 2048, %s2125_s7, %s2127_s26, %s1952_s9, %s1952_s9, %s1953_s10  }
  0x63   : > { %p2379_p3 = scmp.ne.s32.totalorder %s2374_s24, 0 }
  0x64   : > { %s2158_s18 = sand.u32 (!%p2379_p3), 1, %s1929_s13   ;;  %p2380_p7 = scmp.ne.s32.totalorder (!%p2379_p3), %s2372_s22, 0 }
  0x65   : > { %224 = sbr.rel (%p2379_p3) target bundleno = 438 (0x1b6), region = 32  ;;  %s1518_s19 = sshll.u32 (!%p2379_p3), %s2158_s18, 7 }
  0x66   : > { %s227_s29 = scalar_lea.sflag (!%p2379_p3), [#allocation4], %s2158_s18  ;;  %s2162_s28 = scalar_lea.vmem (!%p2379_p3), [#allocation3], %s1518_s19 }
  0x6c   : > { %1912 = dma.done.wait (%p2380_p7), %s227_s29, 2048  }
  0x6d   : > { %1914 = vsyncadd (%p2380_p7), %s227_s29, 4294965248  ;;  %p2381_p10 = scmp.ne.s32.totalorder %s2370_s20, 0 }
  0x6f   : > { %1916 = dma.done.wait (%p2381_p10), [#allocation7], 2080  }
  0x70   : > { %1918 = vsyncadd (%p2381_p10), [#allocation7], 4294965216  ;;  %v1954_v0 = vmov 0   ;;  %v1733_v1 = vld [vmem:[#allocation6 + $0x4] ss:$8 sps:$4 sm:$0xff]   ;;  %v1761_v21 = vld [vmem:[%s2162_s28 + $0x10] sm:$0xff]   ;;  %v1014_v33 = vlaneseq }
  0x71   : > { %656 = vmatprep.mubr.bf16.mxu0 %v1954_v0  ;;  %736 = vmatprep.mubr.bf16.mxu1 %v1954_v0  ;;  %v1735_v2 = vld [vmem:[#allocation6] ss:$8 sps:$4 sm:$0xff]   ;;  %v1736_v3 = vld [vmem:[#allocation6 + $0x14] ss:$8 sps:$4 sm:$0xff]   ;;  %v1738_v4 = vld [vmem:[#allocation6 + $0x10] ss:$8 sps:$4 sm:$0xff]  }
  0x72   : > { %624 = vmatprep.subr.bf16.mxu0 %v1733_v1  ;;  %1627 = vmatprep.subr.bf16.mxu1 %v1733_v1  ;;  %v1739_v5 = vld [vmem:[#allocation6 + $0x24] ss:$8 sps:$4 sm:$0xff]   ;;  %v1741_v6 = vld [vmem:[#allocation6 + $0x20] ss:$8 sps:$4 sm:$0xff]   ;;  %v1742_v7 = vld [vmem:[#allocation6 + $0x34] ss:$8 sps:$4 sm:$0xff]  }
  0x73   : > { %625 = vmatpush1.bf16.msra.mxu0 %v1735_v2  ;;  %1635 = vmatpush1.bf16.msra.mxu1 %v1735_v2  ;;  %v1744_v8 = vld [vmem:[#allocation6 + $0x30] ss:$8 sps:$4 sm:$0xff]   ;;  %v1745_v9 = vld [vmem:[#allocation6 + $0x44] ss:$8 sps:$4 sm:$0xff]   ;;  %v1747_v10 = vld [vmem:[#allocation6 + $0x40] ss:$8 sps:$4 sm:$0xff]  }
  0x74   : > { %626 = vmatprep.subr.bf16.mxu0 %v1736_v3  ;;  %1628 = vmatprep.subr.bf16.mxu1 %v1736_v3  ;;  %v1748_v11 = vld [vmem:[#allocation6 + $0x54] ss:$8 sps:$4 sm:$0xff]   ;;  %v1750_v12 = vld [vmem:[#allocation6 + $0x50] ss:$8 sps:$4 sm:$0xff]   ;;  %v1751_v13 = vld [vmem:[#allocation6 + $0x64] ss:$8 sps:$4 sm:$0xff]  }
  0x75   : > { %v1753_v14 = vld [vmem:[#allocation6 + $0x60] ss:$8 sps:$4 sm:$0xff]   ;;  %v1754_v15 = vld [vmem:[#allocation6 + $0x74] ss:$8 sps:$4 sm:$0xff]   ;;  %v1756_v16 = vld [vmem:[#allocation6 + $0x70] ss:$8 sps:$4 sm:$0xff]  }
  0x76   : > { %v1757_v17 = vld [vmem:[%s2162_s28] sm:$0xff]   ;;  %v1759_v19 = vld [vmem:[%s2162_s28 + $0x8] sm:$0xff]   ;;  %v1762_v22 = vld [vmem:[%s2162_s28 + $0x50] sm:$0xff]   ;;  %v1015_v34 = vshrl.u32 %v1014_v33, 7  ;;  %s1521_s20 = sshll.u32 %s2158_s18, 8  ;;  %s1626_s24 = sshll.u32 %s1937_s15, 12 }
  0x77   : > { %627 = vmatpush1.bf16.msra.mxu0 %v1738_v4  ;;  %1636 = vmatpush1.bf16.msra.mxu1 %v1738_v4  ;;  %v1758_v18 = vld [vmem:[%s2162_s28 + $0x40] sm:$0xff]   ;;  %v1760_v20 = vld [vmem:[%s2162_s28 + $0x48] sm:$0xff]   ;;  %v1763_v23 = vld [vmem:[%s2162_s28 + $0x18] sm:$0xff]   ;;  %s2217_s22 = scalar_lea.vmem [#allocation9], %s1521_s20  ;;  %s2308_s26 = scalar_lea.hbm %s2365_s3, %s1626_s24 }
  0x78   : > { %628 = vmatprep.subr.bf16.mxu0 %v1739_v5  ;;  %1629 = vmatprep.subr.bf16.mxu1 %v1739_v5  ;;  %v1764_v24 = vld [vmem:[%s2162_s28 + $0x58] sm:$0xff]   ;;  %v1765_v25 = vld [vmem:[%s2162_s28 + $0x20] sm:$0xff]   ;;  %v1767_v27 = vld [vmem:[%s2162_s28 + $0x28] sm:$0xff]   ;;  %v1016_v35 = vsub.s32 0, %v1015_v34  ;;  %v1020_v37 = vsub.s32 1, %v1015_v34  ;;  %s1393_s6 = sshll.u32 %s2217_s22, 4  ;;  %s2310_s6 = int_to_ptr.vmem [resolvable:$true] %s1393_s6 }
  0x79   : > { %v1766_v26 = vld [vmem:[%s2162_s28 + $0x60] sm:$0xff]   ;;  %v1768_v28 = vld [vmem:[%s2162_s28 + $0x68] sm:$0xff]   ;;  %v1769_v29 = vld [vmem:[%s2162_s28 + $0x30] sm:$0xff]   ;;  %s1377_s15 = scalar_lea.sflag [#allocation5], %s2158_s18  ;;  %s1859_s25 = scalar_lea.vmem %s2310_s6, 4096 }
  0x7a   : > { %v1770_v30 = vld [vmem:[%s2162_s28 + $0x70] sm:$0xff]   ;;  %v1771_v31 = vld [vmem:[%s2162_s28 + $0x38] sm:$0xff]   ;;  %v1012_v36 = vld [vmem:[#allocation8] sm:$0x3]  ;;  %p1860_p1 = scmp.ne.s32.totalorder %s2310_s6, %s1859_s25  ;;  %s1955_s4 = smov [#allocation9]  }
  0x7b   : > { %629 = vmatpush1.bf16.msra.mxu0 %v1741_v6  ;;  %1637 = vmatpush1.bf16.msra.mxu1 %v1741_v6  ;;  %v1772_v32 = vld [vmem:[%s2162_s28 + $0x78] sm:$0xff]   ;;  %v2204_v38 = vrot.slane %v1012_v36, %v1016_v35  ;;  %v2206_v39 = vrot.slane %v1012_v36, %v1020_v37  ;;  %s1863_s5 = sshll.u32 %s1955_s4, 4  ;;  %s1864_s5 = int_to_ptr.vmem [resolvable:$false] %s1863_s5 }
  0x7c   : > { %630 = vmatprep.subr.bf16.mxu0 %v1742_v7  ;;  %1630 = vmatprep.subr.bf16.mxu1 %v1742_v7  ;;  %p1861_p2 = pnand %p1860_p1, %p2103_p8  ;;  %s1865_s21 = scalar_lea.vmem %s1864_s5, 8192 }
  0x7d   : > { %p1866_p6 = scmp.lt.s32.totalorder %s2310_s6, %s1864_s5  ;;  %p1867_p13 = scmp.lt.s32.totalorder %s1865_s21, %s1859_s25 }
  0x7e   : > { %p1862_p4 = pneg %p1861_p2 }
  0x7f   : > { %631 = vmatpush1.bf16.msra.mxu0 %v1744_v8  ;;  %1638 = vmatpush1.bf16.msra.mxu1 %v1744_v8  ;;  %p1868_p0 = por %p1867_p13, %p1866_p6 }
  0x80   : > { %632 = vmatprep.subr.bf16.mxu0 %v1745_v9  ;;  %1631 = vmatprep.subr.bf16.mxu1 %v1745_v9 }
  0x81   : > { %p1869_p5 = pnand %p1868_p0, %p1862_p4 }
  0x83   : > { %633 = vmatpush1.bf16.msra.mxu0 %v1747_v10  ;;  %1639 = vmatpush1.bf16.msra.mxu1 %v1747_v10 }
  0x84   : > { %634 = vmatprep.subr.bf16.mxu0 %v1748_v11  ;;  %1632 = vmatprep.subr.bf16.mxu1 %v1748_v11 }
  0x87   : > { %635 = vmatpush1.bf16.msra.mxu0 %v1750_v12  ;;  %1640 = vmatpush1.bf16.msra.mxu1 %v1750_v12 }
  0x88   : > { %636 = vmatprep.subr.bf16.mxu0 %v1751_v13  ;;  %1633 = vmatprep.subr.bf16.mxu1 %v1751_v13 }
  0x8b   : > { %637 = vmatpush1.bf16.msra.mxu0 %v1753_v14  ;;  %1641 = vmatpush1.bf16.msra.mxu1 %v1753_v14 }
  0x8c   : > { %638 = vmatprep.subr.bf16.mxu0 %v1754_v15  ;;  %1634 = vmatprep.subr.bf16.mxu1 %v1754_v15 }
  0x8f   : > { %639 = vmatpush1.bf16.msra.mxu0 %v1756_v16  ;;  %1642 = vmatpush1.bf16.msra.mxu1 %v1756_v16 }
  0x92   : > { %657 = vmatmul.mubr.bf16.vlgmr.msra.gmra.mrb[0].mxu0 %v1757_v17  ;;  %737 = vmatmul.mubr.bf16.vlgmr.msra.gmra.mrb[0].mxu1 %v1758_v18 }
  0x93   : > { %666 = vmatprep.mubr.bf16.mxu0 %v1954_v0  ;;  %746 = vmatprep.mubr.bf16.mxu1 %v1954_v0 }
  0x9a   : > { %667 = vmatmul.mubr.bf16.gmra.mrb[4].mxu0 %v1759_v19  ;;  %747 = vmatmul.mubr.bf16.gmra.mrb[4].mxu1 %v1760_v20 }
  0x9b   : > { %676 = vmatprep.mubr.bf16.mxu0 %v1954_v0  ;;  %756 = vmatprep.mubr.bf16.mxu1 %v1954_v0 }
  0xa2   : > { %677 = vmatmul.mubr.bf16.gmra.mrb[8].mxu0 %v1761_v21  ;;  %757 = vmatmul.mubr.bf16.gmra.mrb[8].mxu1 %v1762_v22 }
  0xa3   : > { %686 = vmatprep.mubr.bf16.mxu0 %v1954_v0  ;;  %766 = vmatprep.mubr.bf16.mxu1 %v1954_v0 }
  0xaa   : > { %687 = vmatmul.mubr.bf16.gmra.mrb[12].mxu0 %v1763_v23  ;;  %767 = vmatmul.mubr.bf16.gmra.mrb[12].mxu1 %v1764_v24 }
  0xab   : > { %696 = vmatprep.mubr.bf16.mxu0 %v1954_v0  ;;  %776 = vmatprep.mubr.bf16.mxu1 %v1954_v0 }
  0xb2   : > { %697 = vmatmul.mubr.bf16.gmra.mrb[16].mxu0 %v1765_v25  ;;  %777 = vmatmul.mubr.bf16.gmra.mrb[16].mxu1 %v1766_v26 }
  0xb3   : > { %706 = vmatprep.mubr.bf16.mxu0 %v1954_v0  ;;  %786 = vmatprep.mubr.bf16.mxu1 %v1954_v0 }
  0xba   : > { %707 = vmatmul.mubr.bf16.gmra.mrb[20].mxu0 %v1767_v27  ;;  %787 = vmatmul.mubr.bf16.gmra.mrb[20].mxu1 %v1768_v28 }
  0xbb   : > { %716 = vmatprep.mubr.bf16.mxu0 %v1954_v0  ;;  %796 = vmatprep.mubr.bf16.mxu1 %v1954_v0 }
  0xc2   : > { %717 = vmatmul.mubr.bf16.gmra.mrb[24].mxu0 %v1769_v29  ;;  %797 = vmatmul.mubr.bf16.gmra.mrb[24].mxu1 %v1770_v30 }
  0xc3   : > { %726 = vmatprep.mubr.bf16.mxu0 %v1954_v0  ;;  %806 = vmatprep.mubr.bf16.mxu1 %v1954_v0 }
  0xca   : > { %727 = vmatmul.mubr.bf16.gmra.mrb[28].mxu0 %v1771_v31  ;;  %807 = vmatmul.mubr.bf16.gmra.mrb[28].mxu1 %v1772_v32 }
 0x165   : > { %v658_v40 = vpop.f32.mrb[0].mxu0  ;;  %v738_v41 = vpop.f32.mrb[0].mxu1 }
 0x166   : > { %v1024_v42 = vadd.f32 %v2204_v38, %v658_v40  ;;  %v1056_v43 = vadd.f32 %v2204_v38, %v738_v41  ;;  %v660_v44 = vpop.f32.mrb[1].mxu0  ;;  %v740_v45 = vpop.f32.mrb[1].mxu1 }
 0x167   : > { %v1025_v46 = vadd.f32 %v2206_v39, %v660_v44  ;;  %v1057_v47 = vadd.f32 %v2206_v39, %v740_v45  ;;  %v662_v48 = vpop.f32.mrb[2].mxu0  ;;  %v742_v49 = vpop.f32.mrb[2].mxu1 }
 0x168   : > { %v1088_v50 = vmax.f32 %v1024_v42, 0.0  ;;  %v1120_v51 = vmax.f32 %v1056_v43, 0.0  ;;  %v1026_v52 = vadd.f32 %v2204_v38, %v662_v48  ;;  %v1058_v53 = vadd.f32 %v2204_v38, %v742_v49  ;;  %v664_v54 = vpop.f32.mrb[3].mxu0  ;;  %v744_v55 = vpop.f32.mrb[3].mxu1 }
 0x169   : > { %v1089_v56 = vmax.f32 %v1025_v46, 0.0  ;;  %v1121_v57 = vmax.f32 %v1057_v47, 0.0  ;;  %v1027_v58 = vadd.f32 %v2206_v39, %v664_v54  ;;  %v1059_v59 = vadd.f32 %v2206_v39, %v744_v55 }
 0x16a   : > { %v1090_v60 = vmax.f32 %v1026_v52, 0.0  ;;  %v1122_v61 = vmax.f32 %v1058_v53, 0.0 }
 0x16b   : > { %v1593_v62 = vpack.c.bf16 %v1089_v56, %v1088_v50  ;;  %v1609_v63 = vpack.c.bf16 %v1121_v57, %v1120_v51  ;;  %v1091_v0 = vmax.f32 %v1027_v58, 0.0  ;;  %v1123_v1 = vmax.f32 %v1059_v59, 0.0 }
 0x16d   : > { %1344 = vst [vmem:[%s2217_s22] sm:$0xff] %v1593_v62  ;;  %1360 = vst [vmem:[%s2217_s22 + $0x80] sm:$0xff] %v1609_v63  ;;  %v1594_v2 = vpack.c.bf16 %v1091_v0, %v1090_v60  ;;  %v1610_v3 = vpack.c.bf16 %v1123_v1, %v1122_v61  ;;  %v668_v4 = vpop.f32.mrb[4].mxu0  ;;  %v748_v5 = vpop.f32.mrb[4].mxu1 }
 0x16e   : > { %v1028_v6 = vadd.f32 %v2204_v38, %v668_v4  ;;  %v1060_v7 = vadd.f32 %v2204_v38, %v748_v5  ;;  %v670_v8 = vpop.f32.mrb[5].mxu0  ;;  %v750_v9 = vpop.f32.mrb[5].mxu1 }
 0x16f   : > { %1345 = vst [vmem:[%s2217_s22 + $0x8] sm:$0xff] %v1594_v2  ;;  %1361 = vst [vmem:[%s2217_s22 + $0x88] sm:$0xff] %v1610_v3  ;;  %v1029_v10 = vadd.f32 %v2206_v39, %v670_v8  ;;  %v1061_v11 = vadd.f32 %v2206_v39, %v750_v9  ;;  %v672_v12 = vpop.f32.mrb[6].mxu0  ;;  %v752_v13 = vpop.f32.mrb[6].mxu1 }
 0x170   : > { %v1092_v14 = vmax.f32 %v1028_v6, 0.0  ;;  %v1124_v15 = vmax.f32 %v1060_v7, 0.0  ;;  %v1030_v16 = vadd.f32 %v2204_v38, %v672_v12  ;;  %v1062_v17 = vadd.f32 %v2204_v38, %v752_v13  ;;  %v674_v18 = vpop.f32.mrb[7].mxu0  ;;  %v754_v19 = vpop.f32.mrb[7].mxu1 }
 0x171   : > { %v1093_v20 = vmax.f32 %v1029_v10, 0.0  ;;  %v1125_v21 = vmax.f32 %v1061_v11, 0.0  ;;  %v1031_v22 = vadd.f32 %v2206_v39, %v674_v18  ;;  %v1063_v23 = vadd.f32 %v2206_v39, %v754_v19 }
 0x172   : > { %v1094_v24 = vmax.f32 %v1030_v16, 0.0  ;;  %v1126_v25 = vmax.f32 %v1062_v17, 0.0 }
 0x173   : > { %v1595_v26 = vpack.c.bf16 %v1093_v20, %v1092_v14  ;;  %v1611_v27 = vpack.c.bf16 %v1125_v21, %v1124_v15  ;;  %v1095_v28 = vmax.f32 %v1031_v22, 0.0  ;;  %v1127_v29 = vmax.f32 %v1063_v23, 0.0 }
 0x175   : > { %1346 = vst [vmem:[%s2217_s22 + $0x10] sm:$0xff] %v1595_v26  ;;  %1362 = vst [vmem:[%s2217_s22 + $0x90] sm:$0xff] %v1611_v27  ;;  %v1596_v30 = vpack.c.bf16 %v1095_v28, %v1094_v24  ;;  %v1612_v31 = vpack.c.bf16 %v1127_v29, %v1126_v25  ;;  %v678_v32 = vpop.f32.mrb[8].mxu0  ;;  %v758_v33 = vpop.f32.mrb[8].mxu1 }
 0x176   : > { %v1032_v34 = vadd.f32 %v2204_v38, %v678_v32  ;;  %v1064_v35 = vadd.f32 %v2204_v38, %v758_v33  ;;  %v680_v36 = vpop.f32.mrb[9].mxu0  ;;  %v760_v37 = vpop.f32.mrb[9].mxu1 }
 0x177   : > { %1347 = vst [vmem:[%s2217_s22 + $0x18] sm:$0xff] %v1596_v30  ;;  %1363 = vst [vmem:[%s2217_s22 + $0x98] sm:$0xff] %v1612_v31  ;;  %v1033_v40 = vadd.f32 %v2206_v39, %v680_v36  ;;  %v1065_v41 = vadd.f32 %v2206_v39, %v760_v37  ;;  %v682_v42 = vpop.f32.mrb[10].mxu0  ;;  %v762_v43 = vpop.f32.mrb[10].mxu1 }
 0x178   : > { %v1096_v44 = vmax.f32 %v1032_v34, 0.0  ;;  %v1128_v45 = vmax.f32 %v1064_v35, 0.0  ;;  %v1034_v46 = vadd.f32 %v2204_v38, %v682_v42  ;;  %v1066_v47 = vadd.f32 %v2204_v38, %v762_v43  ;;  %v684_v48 = vpop.f32.mrb[11].mxu0  ;;  %v764_v49 = vpop.f32.mrb[11].mxu1 }
 0x179   : > { %v1097_v50 = vmax.f32 %v1033_v40, 0.0  ;;  %v1129_v51 = vmax.f32 %v1065_v41, 0.0  ;;  %v1035_v52 = vadd.f32 %v2206_v39, %v684_v48  ;;  %v1067_v53 = vadd.f32 %v2206_v39, %v764_v49 }
 0x17a   : > { %v1098_v54 = vmax.f32 %v1034_v46, 0.0  ;;  %v1130_v55 = vmax.f32 %v1066_v47, 0.0 }
 0x17b   : > { %v1597_v56 = vpack.c.bf16 %v1097_v50, %v1096_v44  ;;  %v1613_v57 = vpack.c.bf16 %v1129_v51, %v1128_v45  ;;  %v1099_v58 = vmax.f32 %v1035_v52, 0.0  ;;  %v1131_v59 = vmax.f32 %v1067_v53, 0.0 }
 0x17d   : > { %1348 = vst [vmem:[%s2217_s22 + $0x20] sm:$0xff] %v1597_v56  ;;  %1364 = vst [vmem:[%s2217_s22 + $0xa0] sm:$0xff] %v1613_v57  ;;  %v1598_v60 = vpack.c.bf16 %v1099_v58, %v1098_v54  ;;  %v1614_v61 = vpack.c.bf16 %v1131_v59, %v1130_v55  ;;  %v688_v62 = vpop.f32.mrb[12].mxu0  ;;  %v768_v63 = vpop.f32.mrb[12].mxu1 }
 0x17e   : > { %v1036_v0 = vadd.f32 %v2204_v38, %v688_v62  ;;  %v1068_v1 = vadd.f32 %v2204_v38, %v768_v63  ;;  %v690_v2 = vpop.f32.mrb[13].mxu0  ;;  %v770_v3 = vpop.f32.mrb[13].mxu1 }
 0x17f   : > { %1349 = vst [vmem:[%s2217_s22 + $0x28] sm:$0xff] %v1598_v60  ;;  %1365 = vst [vmem:[%s2217_s22 + $0xa8] sm:$0xff] %v1614_v61  ;;  %v1037_v4 = vadd.f32 %v2206_v39, %v690_v2  ;;  %v1069_v5 = vadd.f32 %v2206_v39, %v770_v3  ;;  %v692_v6 = vpop.f32.mrb[14].mxu0  ;;  %v772_v7 = vpop.f32.mrb[14].mxu1 }
 0x180   : > { %v1100_v8 = vmax.f32 %v1036_v0, 0.0  ;;  %v1132_v9 = vmax.f32 %v1068_v1, 0.0  ;;  %v1038_v10 = vadd.f32 %v2204_v38, %v692_v6  ;;  %v1070_v11 = vadd.f32 %v2204_v38, %v772_v7  ;;  %v694_v12 = vpop.f32.mrb[15].mxu0  ;;  %v774_v13 = vpop.f32.mrb[15].mxu1 }
 0x181   : > { %v1101_v14 = vmax.f32 %v1037_v4, 0.0  ;;  %v1133_v15 = vmax.f32 %v1069_v5, 0.0  ;;  %v1039_v16 = vadd.f32 %v2206_v39, %v694_v12  ;;  %v1071_v17 = vadd.f32 %v2206_v39, %v774_v13 }
 0x182   : > { %v1102_v18 = vmax.f32 %v1038_v10, 0.0  ;;  %v1134_v19 = vmax.f32 %v1070_v11, 0.0 }
 0x183   : > { %v1599_v20 = vpack.c.bf16 %v1101_v14, %v1100_v8  ;;  %v1615_v21 = vpack.c.bf16 %v1133_v15, %v1132_v9  ;;  %v1103_v22 = vmax.f32 %v1039_v16, 0.0  ;;  %v1135_v23 = vmax.f32 %v1071_v17, 0.0 }
 0x185   : > { %1350 = vst [vmem:[%s2217_s22 + $0x30] sm:$0xff] %v1599_v20  ;;  %1366 = vst [vmem:[%s2217_s22 + $0xb0] sm:$0xff] %v1615_v21  ;;  %v1600_v24 = vpack.c.bf16 %v1103_v22, %v1102_v18  ;;  %v1616_v25 = vpack.c.bf16 %v1135_v23, %v1134_v19  ;;  %v698_v26 = vpop.f32.mrb[16].mxu0  ;;  %v778_v27 = vpop.f32.mrb[16].mxu1 }
 0x186   : > { %v1040_v28 = vadd.f32 %v2204_v38, %v698_v26  ;;  %v1072_v29 = vadd.f32 %v2204_v38, %v778_v27  ;;  %v700_v30 = vpop.f32.mrb[17].mxu0  ;;  %v780_v31 = vpop.f32.mrb[17].mxu1 }
 0x187   : > { %1351 = vst [vmem:[%s2217_s22 + $0x38] sm:$0xff] %v1600_v24  ;;  %1367 = vst [vmem:[%s2217_s22 + $0xb8] sm:$0xff] %v1616_v25  ;;  %v1041_v32 = vadd.f32 %v2206_v39, %v700_v30  ;;  %v1073_v33 = vadd.f32 %v2206_v39, %v780_v31  ;;  %v702_v34 = vpop.f32.mrb[18].mxu0  ;;  %v782_v35 = vpop.f32.mrb[18].mxu1 }
 0x188   : > { %v1104_v36 = vmax.f32 %v1040_v28, 0.0  ;;  %v1136_v37 = vmax.f32 %v1072_v29, 0.0  ;;  %v1042_v40 = vadd.f32 %v2204_v38, %v702_v34  ;;  %v1074_v41 = vadd.f32 %v2204_v38, %v782_v35  ;;  %v704_v42 = vpop.f32.mrb[19].mxu0  ;;  %v784_v43 = vpop.f32.mrb[19].mxu1 }
 0x189   : > { %v1105_v44 = vmax.f32 %v1041_v32, 0.0  ;;  %v1137_v45 = vmax.f32 %v1073_v33, 0.0  ;;  %v1043_v46 = vadd.f32 %v2206_v39, %v704_v42  ;;  %v1075_v47 = vadd.f32 %v2206_v39, %v784_v43 }
 0x18a   : > { %v1106_v48 = vmax.f32 %v1042_v40, 0.0  ;;  %v1138_v49 = vmax.f32 %v1074_v41, 0.0 }
 0x18b   : > { %v1601_v50 = vpack.c.bf16 %v1105_v44, %v1104_v36  ;;  %v1617_v51 = vpack.c.bf16 %v1137_v45, %v1136_v37  ;;  %v1107_v52 = vmax.f32 %v1043_v46, 0.0  ;;  %v1139_v53 = vmax.f32 %v1075_v47, 0.0 }
 0x18d   : > { %1352 = vst [vmem:[%s2217_s22 + $0x40] sm:$0xff] %v1601_v50  ;;  %1368 = vst [vmem:[%s2217_s22 + $0xc0] sm:$0xff] %v1617_v51  ;;  %v1602_v54 = vpack.c.bf16 %v1107_v52, %v1106_v48  ;;  %v1618_v55 = vpack.c.bf16 %v1139_v53, %v1138_v49  ;;  %v708_v56 = vpop.f32.mrb[20].mxu0  ;;  %v788_v57 = vpop.f32.mrb[20].mxu1 }
 0x18e   : > { %v1044_v58 = vadd.f32 %v2204_v38, %v708_v56  ;;  %v1076_v59 = vadd.f32 %v2204_v38, %v788_v57  ;;  %v710_v60 = vpop.f32.mrb[21].mxu0  ;;  %v790_v61 = vpop.f32.mrb[21].mxu1 }
 0x18f   : > { %1353 = vst [vmem:[%s2217_s22 + $0x48] sm:$0xff] %v1602_v54  ;;  %1369 = vst [vmem:[%s2217_s22 + $0xc8] sm:$0xff] %v1618_v55  ;;  %v1045_v62 = vadd.f32 %v2206_v39, %v710_v60  ;;  %v1077_v63 = vadd.f32 %v2206_v39, %v790_v61  ;;  %v712_v0 = vpop.f32.mrb[22].mxu0  ;;  %v792_v1 = vpop.f32.mrb[22].mxu1 }
 0x190   : > { %v1108_v2 = vmax.f32 %v1044_v58, 0.0  ;;  %v1140_v3 = vmax.f32 %v1076_v59, 0.0  ;;  %v1046_v4 = vadd.f32 %v2204_v38, %v712_v0  ;;  %v1078_v5 = vadd.f32 %v2204_v38, %v792_v1  ;;  %v714_v6 = vpop.f32.mrb[23].mxu0  ;;  %v794_v7 = vpop.f32.mrb[23].mxu1 }
 0x191   : > { %v1109_v8 = vmax.f32 %v1045_v62, 0.0  ;;  %v1141_v9 = vmax.f32 %v1077_v63, 0.0  ;;  %v1047_v10 = vadd.f32 %v2206_v39, %v714_v6  ;;  %v1079_v11 = vadd.f32 %v2206_v39, %v794_v7 }
 0x192   : > { %v1110_v12 = vmax.f32 %v1046_v4, 0.0  ;;  %v1142_v13 = vmax.f32 %v1078_v5, 0.0 }
 0x193   : > { %v1603_v14 = vpack.c.bf16 %v1109_v8, %v1108_v2  ;;  %v1619_v15 = vpack.c.bf16 %v1141_v9, %v1140_v3  ;;  %v1111_v16 = vmax.f32 %v1047_v10, 0.0  ;;  %v1143_v17 = vmax.f32 %v1079_v11, 0.0 }
 0x195   : > { %1354 = vst [vmem:[%s2217_s22 + $0x50] sm:$0xff] %v1603_v14  ;;  %1370 = vst [vmem:[%s2217_s22 + $0xd0] sm:$0xff] %v1619_v15  ;;  %v1604_v18 = vpack.c.bf16 %v1111_v16, %v1110_v12  ;;  %v1620_v19 = vpack.c.bf16 %v1143_v17, %v1142_v13  ;;  %v718_v20 = vpop.f32.mrb[24].mxu0  ;;  %v798_v21 = vpop.f32.mrb[24].mxu1 }
 0x196   : > { %v1048_v22 = vadd.f32 %v2204_v38, %v718_v20  ;;  %v1080_v23 = vadd.f32 %v2204_v38, %v798_v21  ;;  %v720_v24 = vpop.f32.mrb[25].mxu0  ;;  %v800_v25 = vpop.f32.mrb[25].mxu1 }
 0x197   : > { %1355 = vst [vmem:[%s2217_s22 + $0x58] sm:$0xff] %v1604_v18  ;;  %1371 = vst [vmem:[%s2217_s22 + $0xd8] sm:$0xff] %v1620_v19  ;;  %v1049_v26 = vadd.f32 %v2206_v39, %v720_v24  ;;  %v1081_v27 = vadd.f32 %v2206_v39, %v800_v25  ;;  %v722_v28 = vpop.f32.mrb[26].mxu0  ;;  %v802_v29 = vpop.f32.mrb[26].mxu1 }
 0x198   : > { %v1112_v30 = vmax.f32 %v1048_v22, 0.0  ;;  %v1144_v31 = vmax.f32 %v1080_v23, 0.0  ;;  %v1050_v32 = vadd.f32 %v2204_v38, %v722_v28  ;;  %v1082_v33 = vadd.f32 %v2204_v38, %v802_v29  ;;  %v724_v34 = vpop.f32.mrb[27].mxu0  ;;  %v804_v35 = vpop.f32.mrb[27].mxu1 }
 0x199   : > { %v1113_v36 = vmax.f32 %v1049_v26, 0.0  ;;  %v1145_v37 = vmax.f32 %v1081_v27, 0.0  ;;  %v1051_v40 = vadd.f32 %v2206_v39, %v724_v34  ;;  %v1083_v41 = vadd.f32 %v2206_v39, %v804_v35 }
 0x19a   : > { %v1114_v42 = vmax.f32 %v1050_v32, 0.0  ;;  %v1146_v43 = vmax.f32 %v1082_v33, 0.0 }
 0x19b   : > { %v1605_v44 = vpack.c.bf16 %v1113_v36, %v1112_v30  ;;  %v1621_v45 = vpack.c.bf16 %v1145_v37, %v1144_v31  ;;  %v1115_v46 = vmax.f32 %v1051_v40, 0.0  ;;  %v1147_v47 = vmax.f32 %v1083_v41, 0.0 }
 0x19d   : > { %1356 = vst [vmem:[%s2217_s22 + $0x60] sm:$0xff] %v1605_v44  ;;  %1372 = vst [vmem:[%s2217_s22 + $0xe0] sm:$0xff] %v1621_v45  ;;  %v1606_v48 = vpack.c.bf16 %v1115_v46, %v1114_v42  ;;  %v1622_v49 = vpack.c.bf16 %v1147_v47, %v1146_v43  ;;  %v728_v50 = vpop.f32.mrb[28].mxu0  ;;  %v808_v51 = vpop.f32.mrb[28].mxu1 }
 0x19e   : > { %v1052_v52 = vadd.f32 %v2204_v38, %v728_v50  ;;  %v1084_v53 = vadd.f32 %v2204_v38, %v808_v51  ;;  %v730_v54 = vpop.f32.mrb[29].mxu0  ;;  %v810_v55 = vpop.f32.mrb[29].mxu1 }
 0x19f   : > { %1357 = vst [vmem:[%s2217_s22 + $0x68] sm:$0xff] %v1606_v48  ;;  %1373 = vst [vmem:[%s2217_s22 + $0xe8] sm:$0xff] %v1622_v49  ;;  %v1053_v56 = vadd.f32 %v2206_v39, %v730_v54  ;;  %v1085_v57 = vadd.f32 %v2206_v39, %v810_v55  ;;  %v732_v58 = vpop.f32.mrb[30].mxu0  ;;  %v812_v59 = vpop.f32.mrb[30].mxu1 }
 0x1a0   : > { %v1116_v60 = vmax.f32 %v1052_v52, 0.0  ;;  %v1148_v61 = vmax.f32 %v1084_v53, 0.0  ;;  %v1054_v62 = vadd.f32 %v2204_v38, %v732_v58  ;;  %v1086_v63 = vadd.f32 %v2204_v38, %v812_v59  ;;  %v734_v0 = vpop.f32.mrb[31].mxu0  ;;  %v814_v1 = vpop.f32.mrb[31].mxu1 }
 0x1a1   : > { %v1117_v2 = vmax.f32 %v1053_v56, 0.0  ;;  %v1149_v3 = vmax.f32 %v1085_v57, 0.0  ;;  %v1055_v4 = vadd.f32 %v2206_v39, %v734_v0  ;;  %v1087_v5 = vadd.f32 %v2206_v39, %v814_v1 }
 0x1a2   : > { %v1118_v6 = vmax.f32 %v1054_v62, 0.0  ;;  %v1150_v7 = vmax.f32 %v1086_v63, 0.0 }
 0x1a3   : > { %v1607_v8 = vpack.c.bf16 %v1117_v2, %v1116_v60  ;;  %v1623_v38 = vpack.c.bf16 %v1149_v3, %v1148_v61  ;;  %v1119_v9 = vmax.f32 %v1055_v4, 0.0  ;;  %v1151_v10 = vmax.f32 %v1087_v5, 0.0 }
 0x1a5   : > { %1358 = vst [vmem:[%s2217_s22 + $0x70] sm:$0xff] %v1607_v8  ;;  %1374 = vst [vmem:[%s2217_s22 + $0xf0] sm:$0xff] %v1623_v38  ;;  %v1608_v39 = vpack.c.bf16 %v1119_v9, %v1118_v6  ;;  %v1624_v11 = vpack.c.bf16 %v1151_v10, %v1150_v7 }
 0x1a7   : > { %1359 = vst [vmem:[%s2217_s22 + $0x78] sm:$0xff] %v1608_v39  ;;  %1375 = vst [vmem:[%s2217_s22 + $0xf8] sm:$0xff] %v1624_v11 }
 0x1a8   : > { %1872 = shalt.err (!%p1869_p5)
}
 0x1a9   : > { %s1873_s9 = scalar_lea.hbm %s2308_s26, 4096  ;;  %s1877_s29 = scalar_lea.hbm %s2365_s3, 65536 }
 0x1aa   : > { %p1874_p9 = scmp.ne.s32.totalorder %s2308_s26, %s1873_s9  ;;  %p1878_p3 = scmp.lt.u32.totalorder %s2308_s26, %s2365_s3 }
 0x1ab   : > { %p1879_p7 = scmp.lt.u32.totalorder %s1877_s29, %s1873_s9  ;;  %p1881_p1 = scmp.lt.u32.totalorder %s1873_s9, %s2308_s26 }
 0x1ac   : > { %p1875_p12 = pnand %p1874_p9, %p2103_p8 }
 0x1ad   : > { %p1880_p10 = por %p1879_p7, %p1878_p3 }
 0x1ae   : > { %p1876_p11 = pneg %p1875_p12 }
 0x1af   : > { %p1882_p2 = por %p1881_p1, %p1880_p10 }
 0x1b1   : > { %p1883_p4 = pnand %p1882_p2, %p1876_p11 }
 0x1b3   : > { %1886 = shalt.err (!%p1883_p4)
}
 0x1b4   : > { %s1956_s22 = smov 128   ;;  %s1957_s24 = smov 8  }
 0x1b5   : > { %1653 = dma.vmem_to_hbm [thread:$0]  (%p2103_p8), %s2310_s6, 4096, %s2308_s26, %s1377_s15, %s1956_s22, %s1956_s22, %s1957_s24  }
 0x1b6 PF: > { %p1675_p6 = scmp.ge.s32.totalorder %s1945_s17, 2  ;;  %s1408_s7 = sand.u32 1, %s1925_s12  }
 0x1b7   : > { %p2382_p13 = scmp.ne.s32.totalorder %s2373_s23, 0  ;;  %s1409_s8 = scalar_lea.sflag [#allocation5], %s1408_s7 }
 0x1b9   : > { %p1667_p0 = pnand %p1675_p6, %p2382_p13 }
 0x1bb   : > { %1920 = dma.done.wait (!%p1667_p0), %s1409_s8, 4096  }
 0x1bc   : > { %1922 = vsyncadd (!%p1667_p0), %s1409_s8, 4294963200  ;;  %s20_s17 = sadd.s32 1, %s1945_s17   ;;  %s2383_s12 = smov %s1929_s13 }
 0x1bd   : > { %p17_p5 = scmp.ge.s32.totalorder %s20_s17, 18   ;;  %s2384_s13 = smov %s1933_s14 }
 0x1be   : > { %s2385_s14 = smov %s2112_s30  ;;  %s2386_s15 = smov %s1941_s16 }
 0x1bf   : > { %s2387_s16 = smov %s2389_s11  ;;  %19 = sbr.rel (!%p17_p5) target bundleno = 7 (0x7), region = 95 }
 0x1c6   :  { %1414 = vsyncpa [#allocation4], 1 }
 0x1c7   :  { %1416 = vsyncpa [#allocation4 + $0x1], 1 }
 0x1c8   :  { %1417 = vsyncpa [#allocation7], 1 }
 0x1c9   :  { %1418 = vsyncpa [#allocation5], 1 }
 0x1ca   :  { %1420 = vsyncpa [#allocation5 + $0x1], 1 }

</bundles_post_ra>
